<compile_context>
chip_gen: v6e
topology: v6e:2x2x1
jax: 0.10.0
libtpu: 0.0.40
codegen_flags: <defaults>
</compile_context>

<pallas_src>
import jax
import jax.numpy as jnp
from jax import lax
from jax.experimental import pallas as pl
from jax.experimental.pallas import tpu as pltpu

EPS = 1e-5  # nn.GroupNorm default eps


# ----------------------------------------------------------------------------
# Kernel
# ----------------------------------------------------------------------------
def _make_sa_kernel(hw, lane_aligned):
    inv_hw = 1.0 / float(hw)

    def kernel(x_ref, p_ref, o_ref):
        # x_ref: (1, 2, R, HW)   p_ref: (3, 2, R, 1)   o_ref: (1, R, 2*HW)
        halves = []
        for k in range(2):  # unrolled; k = which half of the channel axis
            xf = x_ref[0, k].astype(jnp.float32)          # (R, HW), f32 math
            s_a = p_ref[0, k]                             # (R, 1)
            s_b = p_ref[1, k]
            s_m = p_ref[2, k]
            # two-pass, per-row statistics (robust vs E[x^2]-mean^2 cancellation)
            mean = jnp.sum(xf, axis=1, keepdims=True) * inv_hw
            xc = xf - mean
            var = jnp.sum(xc * xc, axis=1, keepdims=True) * inv_hw
            a = s_a * lax.rsqrt(var + EPS)     # exactly 0 for channel-attn rows
            z = a * xc + (s_m * mean + s_b)
            gate = 0.5 * jnp.tanh(0.5 * z) + 0.5   # sigmoid, single EUP op
            y = (xf * gate).astype(o_ref.dtype)
            if lane_aligned:
                # post-shuffle layout: channel (2m+k) lives at lanes [k*HW,(k+1)*HW)
                o_ref[0, :, k * hw:(k + 1) * hw] = y
            else:
                halves.append(y)
        if not lane_aligned:
            # HW not a multiple of 128: build the full post-shuffle row in
            # registers (lane shifts on the XLU) and issue one dense store —
            # no extra HBM transpose pass.
            o_ref[0] = jnp.concatenate(halves, axis=-1)

    return kernel


# ----------------------------------------------------------------------------
# Tiling / VMEM heuristics
# ----------------------------------------------------------------------------
def _vmem_capacity_bytes():
    try:
        cap = getattr(pltpu.get_tpu_info(), "vmem_capacity_bytes", None)
        if cap:
            return int(cap)
    except Exception:
        pass
    return 64 << 20  # assume the smallest (v7x per-TensorCore) if unknown


def _pick_rows(half_c, hw, nbatch, itemsize, target_bytes):
    """Rows per channel-half per grid step (sublane-dense, ragged-grid friendly)."""
    sub = 8 * max(1, 4 // itemsize)      # sublane granularity for this dtype
    if half_c <= sub or half_c % sub != 0:
        return half_c                     # one block spanning the whole half (always legal)
    max_rows = max(sub, (target_bytes // (hw * itemsize)) // sub * sub)
    r = int(min(half_c, max_rows))
    # v7x has 2 TensorCores: keep >= 4 grid steps (>= 2 per core) when possible
    # so the "parallel" axes actually shard and the pipeline reaches steady state.
    while r > sub and nbatch * pl.cdiv(half_c, r) < 4:
        r -= sub
    return r


# ----------------------------------------------------------------------------
# Wrapper
# ----------------------------------------------------------------------------
def sa_layer_forward(x, params, groups):
    """Pallas-backed sa_layer forward. x: (b, c, h, w) with c % (2*groups) == 0."""
    b, c, h, w = x.shape
    c2 = c // (2 * groups)
    assert c == 2 * groups * c2, "channel must be divisible by 2*groups"
    half_c = c // 2
    hw = h * w
    itemsize = x.dtype.itemsize
    lane_aligned = (hw % 128 == 0)

    # ---- fold the six (c2,) parameter vectors into 3 per-channel constants ----
    ch = jnp.arange(c)
    j = ch % c2
    is_spatial = ((ch % (2 * c2)) // c2) == 1   # second half of each group slab

    def pick(name):
        return params[name].reshape(-1).astype(jnp.float32)[j]

    cw, cb = pick("cweight"), pick("cbias")
    sw, sb = pick("sweight"), pick("sbias")
    gw, gb = pick("gn_weight"), pick("gn_bias")
    s_a = jnp.where(is_spatial, sw * gw, 0.0)
    s_b = jnp.where(is_spatial, sw * gb + sb, cb)
    s_m = jnp.where(is_spatial, 0.0, cw)
    p = jnp.stack([s_a, s_b, s_m], axis=0).reshape(3, 2, half_c, 1)

    x4 = x.reshape(b, 2, half_c, hw)            # free view, no HBM copy

    vmem_cap = _vmem_capacity_bytes()
    # per-half input-block target: 2 MiB on 128-MiB-VMEM parts (v5e/v6e), 1 MiB on v7x
    target = (2 << 20) if vmem_cap >= (96 << 20) else (1 << 20)
    r = _pick_rows(half_c, hw, b, itemsize, target)
    nmb = int(pl.cdiv(half_c, r))               # ragged last block handled by Pallas

    # derived VMEM budget: double-buffered in/out blocks + f32 temporaries + slack
    in_block = 2 * r * hw * itemsize
    out_block = 2 * r * hw * itemsize
    work = 4 * r * hw * 4
    vmem_needed = 2 * (in_block + out_block) + work + (4 << 20)
    vmem_limit = int(min(max(vmem_needed, 8 << 20), min(48 << 20, vmem_cap // 2)))

    n_elem = b * c * hw
    cost = pl.CostEstimate(
        flops=11 * n_elem,
        transcendentals=n_elem,
        bytes_accessed=2 * n_elem * itemsize + 3 * c * 4,
    )

    out = pl.pallas_call(
        _make_sa_kernel(hw, lane_aligned),
        out_shape=jax.ShapeDtypeStruct((b, half_c, 2 * hw), x.dtype),
        grid_spec=pltpu.PrefetchScalarGridSpec(
            num_scalar_prefetch=0,
            grid=(b, nmb),
            in_specs=[
                pl.BlockSpec((1, 2, r, hw), lambda i, m: (i, 0, m, 0)),
                pl.BlockSpec((3, 2, r, 1), lambda i, m: (0, 0, m, 0)),
            ],
            out_specs=pl.BlockSpec((1, r, 2 * hw), lambda i, m: (i, m, 0)),
        ),
        compiler_params=pltpu.CompilerParams(
            dimension_semantics=("parallel", "parallel"),
            vmem_limit_bytes=vmem_limit,
        ),
        cost_estimate=cost,
    )(x4, p)

    # (b, half_c, 2*hw) is already the post-shuffle channel order -> free reshape
    return out.reshape(b, c, h, w)
    # TODO(synk): optional v7x micro-opt (mean via MXU dot-with-ones) left out;
    # only relevant if a bundle dump shows VALU as the saturating slot with bf16 I/O.


# ----------------------------------------------------------------------------
# Pure-JAX reference (matches the PyTorch forward) + test harness
# ----------------------------------------------------------------------------
def sa_layer_reference(x, params, groups):
    b, c, h, w = x.shape
    c2 = c // (2 * groups)
    xr = x.reshape(b * groups, 2 * c2, h, w)
    x0, x1 = xr[:, :c2], xr[:, c2:]

    cw = params["cweight"].reshape(1, c2, 1, 1)
    cb = params["cbias"].reshape(1, c2, 1, 1)
    sw = params["sweight"].reshape(1, c2, 1, 1)
    sb = params["sbias"].reshape(1, c2, 1, 1)
    gw = params["gn_weight"].reshape(1, c2, 1, 1)
    gb = params["gn_bias"].reshape(1, c2, 1, 1)

    xn = jnp.mean(x0, axis=(2, 3), keepdims=True)
    xn = x0 * jax.nn.sigmoid(cw * xn + cb)

    mu = jnp.mean(x1, axis=(2, 3), keepdims=True)
    var = jnp.mean((x1 - mu) ** 2, axis=(2, 3), keepdims=True)
    x1n = (x1 - mu) / jnp.sqrt(var + EPS) * gw + gb
    xs = x1 * jax.nn.sigmoid(sw * x1n + sb)

    out = jnp.concatenate([xn, xs], axis=1).reshape(b, c, h, w)
    out = out.reshape(b, 2, c // 2, h, w).transpose(0, 2, 1, 3, 4).reshape(b, c, h, w)
    return out


def _make_params(key, c2):
    ks = jax.random.split(key, 6)
    # PyTorch defaults are zeros/ones; use small random values so every term of
    # the folded math is actually exercised.
    return {
        "cweight":   0.5 * jax.random.normal(ks[0], (c2,), jnp.float32),
        "cbias":     1.0 + 0.1 * jax.random.normal(ks[1], (c2,), jnp.float32),
        "sweight":   0.5 * jax.random.normal(ks[2], (c2,), jnp.float32),
        "sbias":     1.0 + 0.1 * jax.random.normal(ks[3], (c2,), jnp.float32),
        "gn_weight": 1.0 + 0.1 * jax.random.normal(ks[4], (c2,), jnp.float32),
        "gn_bias":   0.1 * jax.random.normal(ks[5], (c2,), jnp.float32),
    }


if __name__ == "__main__":
    key = jax.random.PRNGKey(0)
    configs = [
        # (b, c, h, w, groups, dtype, tol)
        (2, 32, 16, 16, 4, jnp.float32, 5e-5),   # HW%128==0 : aligned fused shuffle
        (2, 32, 12, 12, 4, jnp.float32, 5e-5),   # HW%128!=0 : in-register concat, no transpose pass
        (1, 24, 16, 16, 3, jnp.float32, 5e-5),   # half_c not a multiple of 8 -> full-height block
        (2, 80, 16, 16, 5, jnp.float32, 5e-5),   # ragged row grid (half_c=40, r=32)
        (2, 32, 16, 16, 4, jnp.bfloat16, 3e-2),  # bf16 I/O (dtype-aware tiling, f32 math)
    ]
    fwd = jax.jit(sa_layer_forward, static_argnums=2)
    for idx, (b, c, h, w, groups, dtype, tol) in enumerate(configs):
        kx, kp = jax.random.split(jax.random.fold_in(key, idx))
        x = jax.random.normal(kx, (b, c, h, w), dtype=jnp.float32).astype(dtype)
        params = _make_params(kp, c // (2 * groups))

        out = jax.block_until_ready(fwd(x, params, groups))
        ref = sa_layer_reference(x.astype(jnp.float32), params, groups)

        assert out.shape == (b, c, h, w)
        err = float(jnp.max(jnp.abs(out.astype(jnp.float32) - ref)))
        assert err < tol, f"Pallas kernel mismatch vs reference (config {idx}): {err}"

    print("KERNEL_OK")
</pallas_src>

<mosaic_0001>
module attributes {stable_mosaic.version = 11 : i64} {
  func.func @kernel(%arg0: i32, %arg1: i32, %arg2: memref<1x2x8x256xf32, #tpu.memory_space<vmem>>, %arg3: memref<3x2x8x1xf32, #tpu.memory_space<vmem>>, %arg4: memref<1x8x512xf32, #tpu.memory_space<vmem>>) attributes {dimension_semantics = [#tpu.dimension_semantics<parallel>, #tpu.dimension_semantics<parallel>], iteration_bounds = array<i64: 2, 2>, scalar_prefetch = 0 : i64, scratch_operands = 0 : i64, tpu.core_type = #tpu.core_type<tc>, window_params = [{transform_indices = @transform_0, window_bounds = array<i64: 1, 2, 8, 256>}, {transform_indices = @transform_1, window_bounds = array<i64: 3, 2, 8, 1>}, {transform_indices = @transform_2, window_bounds = array<i64: 1, 8, 512>}]} {
    %c0 = arith.constant 0 : index
    %c0_0 = arith.constant 0 : index
    %c0_1 = arith.constant 0 : index
    %c0_2 = arith.constant 0 : index
    %0 = vector.load %arg2[%c0, %c0_0, %c0_1, %c0_2] : memref<1x2x8x256xf32, #tpu.memory_space<vmem>>, vector<1x1x8x256xf32>
    %1 = vector.shape_cast %0 : vector<1x1x8x256xf32> to vector<8x256xf32>
    %c0_3 = arith.constant 0 : index
    %c0_4 = arith.constant 0 : index
    %c0_5 = arith.constant 0 : index
    %c0_6 = arith.constant 0 : index
    %2 = vector.load %arg3[%c0_3, %c0_4, %c0_5, %c0_6] : memref<3x2x8x1xf32, #tpu.memory_space<vmem>>, vector<1x1x8x1xf32>
    %3 = vector.shape_cast %2 : vector<1x1x8x1xf32> to vector<8x1xf32>
    %c1 = arith.constant 1 : index
    %c0_7 = arith.constant 0 : index
    %c0_8 = arith.constant 0 : index
    %c0_9 = arith.constant 0 : index
    %4 = vector.load %arg3[%c1, %c0_7, %c0_8, %c0_9] : memref<3x2x8x1xf32, #tpu.memory_space<vmem>>, vector<1x1x8x1xf32>
    %5 = vector.shape_cast %4 : vector<1x1x8x1xf32> to vector<8x1xf32>
    %c2 = arith.constant 2 : index
    %c0_10 = arith.constant 0 : index
    %c0_11 = arith.constant 0 : index
    %c0_12 = arith.constant 0 : index
    %6 = vector.load %arg3[%c2, %c0_10, %c0_11, %c0_12] : memref<3x2x8x1xf32, #tpu.memory_space<vmem>>, vector<1x1x8x1xf32>
    %7 = vector.shape_cast %6 : vector<1x1x8x1xf32> to vector<8x1xf32>
    %cst = arith.constant dense<0.000000e+00> : vector<8xf32>
    %8 = vector.multi_reduction <add>, %1, %cst [1] : vector<8x256xf32> to vector<8xf32>
    %9 = vector.shape_cast %8 : vector<8xf32> to vector<8x1xf32>
    %cst_13 = arith.constant 3.906250e-03 : f32
    %10 = vector.broadcast %cst_13 : f32 to vector<8x1xf32>
    %11 = arith.mulf %9, %10 : vector<8x1xf32>
    %12 = vector.broadcast %11 : vector<8x1xf32> to vector<8x256xf32>
    %13 = arith.subf %1, %12 : vector<8x256xf32>
    %14 = arith.mulf %13, %13 : vector<8x256xf32>
    %cst_14 = arith.constant dense<0.000000e+00> : vector<8xf32>
    %15 = vector.multi_reduction <add>, %14, %cst_14 [1] : vector<8x256xf32> to vector<8xf32>
    %16 = vector.shape_cast %15 : vector<8xf32> to vector<8x1xf32>
    %cst_15 = arith.constant 3.906250e-03 : f32
    %17 = vector.broadcast %cst_15 : f32 to vector<8x1xf32>
    %18 = arith.mulf %16, %17 : vector<8x1xf32>
    %cst_16 = arith.constant 9.99999974E-6 : f32
    %19 = vector.broadcast %cst_16 : f32 to vector<8x1xf32>
    %20 = arith.addf %18, %19 : vector<8x1xf32>
    %21 = math.rsqrt %20 : vector<8x1xf32>
    %22 = arith.mulf %3, %21 : vector<8x1xf32>
    %23 = vector.broadcast %22 : vector<8x1xf32> to vector<8x256xf32>
    %24 = arith.mulf %23, %13 : vector<8x256xf32>
    %25 = arith.mulf %7, %11 : vector<8x1xf32>
    %26 = arith.addf %25, %5 : vector<8x1xf32>
    %27 = vector.broadcast %26 : vector<8x1xf32> to vector<8x256xf32>
    %28 = arith.addf %24, %27 : vector<8x256xf32>
    %cst_17 = arith.constant 5.000000e-01 : f32
    %29 = vector.broadcast %cst_17 : f32 to vector<8x256xf32>
    %30 = arith.mulf %29, %28 : vector<8x256xf32>
    %31 = math.tanh %30 : vector<8x256xf32>
    %cst_18 = arith.constant 5.000000e-01 : f32
    %32 = vector.broadcast %cst_18 : f32 to vector<8x256xf32>
    %33 = arith.mulf %32, %31 : vector<8x256xf32>
    %cst_19 = arith.constant 5.000000e-01 : f32
    %34 = vector.broadcast %cst_19 : f32 to vector<8x256xf32>
    %35 = arith.addf %33, %34 : vector<8x256xf32>
    %36 = arith.mulf %1, %35 : vector<8x256xf32>
    %c0_20 = arith.constant 0 : index
    %c0_21 = arith.constant 0 : index
    %c0_22 = arith.constant 0 : index
    %37 = vector.load %arg4[%c0_20, %c0_21, %c0_22] : memref<1x8x512xf32, #tpu.memory_space<vmem>>, vector<1x8x256xf32>
    %38 = vector.shape_cast %37 : vector<1x8x256xf32> to vector<8x256xf32>
    %39 = vector.shape_cast %36 : vector<8x256xf32> to vector<1x8x256xf32>
    tpu.vector_store %arg4[%c0_20, %c0_21, %c0_22], %39 {strides = array<i32>} : memref<1x8x512xf32, #tpu.memory_space<vmem>>, vector<1x8x256xf32>,
    %c0_23 = arith.constant 0 : index
    %c1_24 = arith.constant 1 : index
    %c0_25 = arith.constant 0 : index
    %c0_26 = arith.constant 0 : index
    %40 = vector.load %arg2[%c0_23, %c1_24, %c0_25, %c0_26] : memref<1x2x8x256xf32, #tpu.memory_space<vmem>>, vector<1x1x8x256xf32>
    %41 = vector.shape_cast %40 : vector<1x1x8x256xf32> to vector<8x256xf32>
    %c0_27 = arith.constant 0 : index
    %c1_28 = arith.constant 1 : index
    %c0_29 = arith.constant 0 : index
    %c0_30 = arith.constant 0 : index
    %42 = vector.load %arg3[%c0_27, %c1_28, %c0_29, %c0_30] : memref<3x2x8x1xf32, #tpu.memory_space<vmem>>, vector<1x1x8x1xf32>
    %43 = vector.shape_cast %42 : vector<1x1x8x1xf32> to vector<8x1xf32>
    %c1_31 = arith.constant 1 : index
    %c1_32 = arith.constant 1 : index
    %c0_33 = arith.constant 0 : index
    %c0_34 = arith.constant 0 : index
    %44 = vector.load %arg3[%c1_31, %c1_32, %c0_33, %c0_34] : memref<3x2x8x1xf32, #tpu.memory_space<vmem>>, vector<1x1x8x1xf32>
    %45 = vector.shape_cast %44 : vector<1x1x8x1xf32> to vector<8x1xf32>
    %c2_35 = arith.constant 2 : index
    %c1_36 = arith.constant 1 : index
    %c0_37 = arith.constant 0 : index
    %c0_38 = arith.constant 0 : index
    %46 = vector.load %arg3[%c2_35, %c1_36, %c0_37, %c0_38] : memref<3x2x8x1xf32, #tpu.memory_space<vmem>>, vector<1x1x8x1xf32>
    %47 = vector.shape_cast %46 : vector<1x1x8x1xf32> to vector<8x1xf32>
    %cst_39 = arith.constant dense<0.000000e+00> : vector<8xf32>
    %48 = vector.multi_reduction <add>, %41, %cst_39 [1] : vector<8x256xf32> to vector<8xf32>
    %49 = vector.shape_cast %48 : vector<8xf32> to vector<8x1xf32>
    %cst_40 = arith.constant 3.906250e-03 : f32
    %50 = vector.broadcast %cst_40 : f32 to vector<8x1xf32>
    %51 = arith.mulf %49, %50 : vector<8x1xf32>
    %52 = vector.broadcast %51 : vector<8x1xf32> to vector<8x256xf32>
    %53 = arith.subf %41, %52 : vector<8x256xf32>
    %54 = arith.mulf %53, %53 : vector<8x256xf32>
    %cst_41 = arith.constant dense<0.000000e+00> : vector<8xf32>
    %55 = vector.multi_reduction <add>, %54, %cst_41 [1] : vector<8x256xf32> to vector<8xf32>
    %56 = vector.shape_cast %55 : vector<8xf32> to vector<8x1xf32>
    %cst_42 = arith.constant 3.906250e-03 : f32
    %57 = vector.broadcast %cst_42 : f32 to vector<8x1xf32>
    %58 = arith.mulf %56, %57 : vector<8x1xf32>
    %cst_43 = arith.constant 9.99999974E-6 : f32
    %59 = vector.broadcast %cst_43 : f32 to vector<8x1xf32>
    %60 = arith.addf %58, %59 : vector<8x1xf32>
    %61 = math.rsqrt %60 : vector<8x1xf32>
    %62 = arith.mulf %43, %61 : vector<8x1xf32>
    %63 = vector.broadcast %62 : vector<8x1xf32> to vector<8x256xf32>
    %64 = arith.mulf %63, %53 : vector<8x256xf32>
    %65 = arith.mulf %47, %51 : vector<8x1xf32>
    %66 = arith.addf %65, %45 : vector<8x1xf32>
    %67 = vector.broadcast %66 : vector<8x1xf32> to vector<8x256xf32>
    %68 = arith.addf %64, %67 : vector<8x256xf32>
    %cst_44 = arith.constant 5.000000e-01 : f32
    %69 = vector.broadcast %cst_44 : f32 to vector<8x256xf32>
    %70 = arith.mulf %69, %68 : vector<8x256xf32>
    %71 = math.tanh %70 : vector<8x256xf32>
    %cst_45 = arith.constant 5.000000e-01 : f32
    %72 = vector.broadcast %cst_45 : f32 to vector<8x256xf32>
    %73 = arith.mulf %72, %71 : vector<8x256xf32>
    %cst_46 = arith.constant 5.000000e-01 : f32
    %74 = vector.broadcast %cst_46 : f32 to vector<8x256xf32>
    %75 = arith.addf %73, %74 : vector<8x256xf32>
    %76 = arith.mulf %41, %75 : vector<8x256xf32>
    %c0_47 = arith.constant 0 : index
    %c0_48 = arith.constant 0 : index
    %c256 = arith.constant 256 : index
    %77 = vector.load %arg4[%c0_47, %c0_48, %c256] : memref<1x8x512xf32, #tpu.memory_space<vmem>>, vector<1x8x256xf32>
    %78 = vector.shape_cast %77 : vector<1x8x256xf32> to vector<8x256xf32>
    %79 = vector.shape_cast %76 : vector<8x256xf32> to vector<1x8x256xf32>
    tpu.vector_store %arg4[%c0_47, %c0_48, %c256], %79 {strides = array<i32>} : memref<1x8x512xf32, #tpu.memory_space<vmem>>, vector<1x8x256xf32>,
    return
  }
  func.func @transform_0(%arg0: i32, %arg1: i32) -> (i32, i32, i32, i32) {
    %c0_i32 = arith.constant 0 : i32
    %c0_i32_0 = arith.constant 0 : i32
    %c0_i32_1 = arith.constant 0 : i32
    return %arg0, %c0_i32, %arg1, %c0_i32_0 : i32, i32, i32, i32
  }
  func.func @transform_1(%arg0: i32, %arg1: i32) -> (i32, i32, i32, i32) {
    %c0_i32 = arith.constant 0 : i32
    %c0_i32_0 = arith.constant 0 : i32
    %c0_i32_1 = arith.constant 0 : i32
    %c0_i32_2 = arith.constant 0 : i32
    return %c0_i32, %c0_i32_0, %arg1, %c0_i32_1 : i32, i32, i32, i32
  }
  func.func @transform_2(%arg0: i32, %arg1: i32) -> (i32, i32, i32) {
    %c0_i32 = arith.constant 0 : i32
    %c0_i32_0 = arith.constant 0 : i32
    return %arg0, %arg1, %c0_i32 : i32, i32, i32
  }
}

</mosaic_0001>

<bundles_post_ra>
// kernel: sa_layer_forward.1
= control target key start
LH: loop header
LB: loop body
LE: loop exit
PB: predicated region body
PF: predicated region fallthrough
CT: control target
= control target key end

     0   :  { %s686_s9 = smov 0   ;;  %s688_s10 = smov 0   ;;  %s837_s0 = inlined_call_operand.vmem [shape: f32[2,2,16,256], index: 0, kind: input, shape index: {}]   ;;  %s838_s1 = inlined_call_operand.vmem [shape: f32[3,2,16,1], index: 1, kind: input, shape index: {}]   ;;  %s839_s2 = inlined_call_operand.vmem [shape: f32[2,16,512], index: 2, kind: output, shape index: {}]  }
   0x1   :  { %s690_s11 = smov 0   ;;  %s692_s12 = smov 0  }
   0x2   :  { %s694_s13 = smov 0   ;;  %s696_s14 = smov 0  }
   0x3   :  { %s698_s15 = smov 0   ;;  %s700_s16 = smov 0  }
   0x4   :  { %s702_s17 = smov 0  }
   0x5 LB: > { %s21_s18 = sadd.s32 1, %s660_s15  ;;  %s24_s19 = sadd.s32 1, %s664_s16  ;;  %s668_s17 = sphi %s702_s17, %s12_s17   ;;  %s664_s16 = sphi %s700_s16, %s849_s16   ;;  %s660_s15 = sphi %s698_s15, %s848_s15   ;;  %s656_s14 = sphi %s696_s14, %s847_s14   ;;  %s652_s13 = sphi %s694_s13, %s846_s13   ;;  %s648_s12 = sphi %s692_s12, %s845_s12   ;;  %s644_s11 = sphi %s690_s11, %s844_s11   ;;  %s640_s10 = sphi %s688_s10, %s843_s10   ;;  %s636_s9 = sphi %s686_s9, %s842_s9  }
   0x6   : > { %p22_p0 = scmp.ge.s32.totalorder %s21_s18, 2  ;;  %p40_p1 = scmp.ne.s32.totalorder %s648_s12, %s644_s11 }
   0x7   : > { %p41_p2 = scmp.eq.s32.totalorder %s668_s17, 0  ;;  %s59_s22 = sadd.s32 1, %s640_s10 }
   0x8   : > { %s851_s18 = smov (%p22_p0, %s21_s18), 0  ;;  %s853_s19 = smov (!%p22_p0, %s24_s19), %s664_s16 }
   0x9   : > { %s29_s20 = ssub.s32 %s660_s15, %s851_s18  ;;  %p741_p3 = por %p41_p2, %p40_p1 }
   0xa   : > { %p26_p4 = scmp.ge.s32.totalorder %s853_s19, 2  ;;  %p57_p5 = scmp.eq.s32.totalorder %s29_s20, 0 }
   0xb   : > { %p66_p6 = scmp.ne.s32.totalorder %s640_s10, %s636_s9  ;;  %s33_s27 = sadd.s32 1, %s648_s12 }
   0xc   : > { %s855_s19 = smov (%p26_p4, %s853_s19), 0  ;;  %p489_p9 = scmp.ge.s32.totalorder %s668_s17, 4 }
   0xd   : > { %s751_s23 = scalar_select %p57_p5, %s640_s10, %s59_s22  }
   0xe   : > { %s28_s24 = ssub.s32 %s664_s16, %s855_s19  ;;  %p755_p7 = por %p66_p6, %p41_p2 }
   0xf   : > { %s30_s26 = sor.u32 %s29_s20, %s28_s24  ;;  %120 = sbr.rel (%p489_p9) target bundleno = 36 (0x24), region = 16 }
  0x10   : > { %p31_p8 = scmp.eq.s32.totalorder %s30_s26, 0 }
  0x12   : > { %s761_s28 = scalar_select %p31_p8, %s648_s12, %s33_s27  }
  0x14   : > { %123 = sbr.rel (!%p741_p3) target bundleno = 29 (0x1d), region = 20  ;;  %s125_s29 = sand.u32 (%p741_p3), 1, %s648_s12  }
  0x15   : > { %s491_s30 = sshll.u32 (%p741_p3), %s660_s15, 1  ;;  %s490_s3 = sshll.u32 (%p741_p3), %s125_s29, 5 }
  0x16   : > { %s492_s4 = sshll.u32 (%p741_p3), %s664_s16, 3  ;;  %s127_s22 = scalar_lea.vmem (%p741_p3), [#allocation2], %s490_s3 }
  0x17   : > { %s130_s5 = sadd.s32 (%p741_p3), %s492_s4, %s491_s30 }
  0x18   : > { %s493_s6 = sshll.u32 (%p741_p3), %s130_s5, 3 }
  0x19   : > { %s132_s20 = scalar_lea.vmem %s837_s0, %s493_s6 }
  0x1a   : > { %v145_v0 = vld [vmem:[%s132_s20] sm:$0xff]  ;;  %v147_v1 = vld [vmem:[%s132_s20 + $0x8] sm:$0xff] }
  0x1b   : > { %v149_v2 = vld [vmem:[%s132_s20 + $0x20] sm:$0xff]  ;;  %146 = vst [vmem:[%s127_s22] sm:$0xff] %v145_v0  ;;  %148 = vst [vmem:[%s127_s22 + $0x8] sm:$0xff] %v147_v1  ;;  %v151_v3 = vld [vmem:[%s132_s20 + $0x28] sm:$0xff] }
  0x1c   : > { %150 = vst [vmem:[%s127_s22 + $0x10] sm:$0xff] %v149_v2  ;;  %152 = vst [vmem:[%s127_s22 + $0x18] sm:$0xff] %v151_v3 }
  0x1d PF: > { %158 = sbr.rel (!%p755_p7) target bundleno = 36 (0x24), region = 43  ;;  %s160_s21 = sand.u32 (%p755_p7), 1, %s640_s10  }
  0x1e   : > { %s494_s24 = sshll.u32 (%p755_p7), %s660_s15, 3  ;;  %s509_s26 = smul.u32 (%p755_p7), 48, %s160_s21 }
  0x1f   : > { %s164_s30 = scalar_lea.vmem (%p755_p7), %s838_s1, %s494_s24 }
  0x20   : > { %v203_v4 = vld [vmem:[%s164_s30] sm:$0xff] (%p755_p7)  ;;  %v205_v5 = vld [vmem:[%s164_s30 + $0x10] sm:$0xff] (%p755_p7)  ;;  %s162_s3 = scalar_lea.vmem (%p755_p7), [#allocation3], %s509_s26 }
  0x21   : > { %v207_v6 = vld [vmem:[%s164_s30 + $0x20] sm:$0xff] (%p755_p7)  ;;  %v209_v7 = vld [vmem:[%s164_s30 + $0x30] sm:$0xff] (%p755_p7)  ;;  %204 = vst [vmem:[%s162_s3] sm:$0xff] (%p755_p7), %v203_v4  ;;  %206 = vst [vmem:[%s162_s3 + $0x8] sm:$0xff] (%p755_p7), %v205_v5 }
  0x22   : > { %v211_v8 = vld [vmem:[%s164_s30 + $0x40] sm:$0xff]  ;;  %v213_v9 = vld [vmem:[%s164_s30 + $0x50] sm:$0xff]  ;;  %208 = vst [vmem:[%s162_s3 + $0x10] sm:$0xff] %v207_v6  ;;  %210 = vst [vmem:[%s162_s3 + $0x18] sm:$0xff] %v209_v7 }
  0x23   : > { %212 = vst [vmem:[%s162_s3 + $0x20] sm:$0xff] %v211_v8  ;;  %214 = vst [vmem:[%s162_s3 + $0x28] sm:$0xff] %v213_v9 }
  0x24 PF: > { %p495_p10 = scmp.ge.s32.totalorder %s668_s17, 1  ;;  %p219_p11 = scmp.lt.s32.totalorder %s668_s17, 5 }
  0x26   : > { %p220_p12 = pnand %p495_p10, %p219_p11 }
  0x27   : > { %s226_s25 = sand.u32 (!%p220_p12), 1, %s644_s11   ;;  %s233_s11 = sand.u32 (!%p220_p12), 1, %s636_s9  }
  0x28   : > { %223 = sbr.rel (%p220_p12) target bundleno = 510 (0x1fe), region = 81  ;;  %s496_s4 = sshll.u32 (!%p220_p12), %s226_s25, 5 }
  0x29   : > { %s228_s5 = scalar_lea.vmem (!%p220_p12), [#allocation2], %s496_s4  ;;  %s510_s6 = smul.u32 (!%p220_p12), 48, %s233_s11 }
  0x2a   : > { %p262_p13 = scmp.lt.s32.totalorder (!%p220_p12), %s656_s14, 1  ;;  %p264_p0 = scmp.lt.s32.totalorder (!%p220_p12), %s652_s13, 1 }
  0x2b   : > { %s235_s7 = scalar_lea.vmem (!%p220_p12), [#allocation3], %s510_s6 }
  0x2d   : > { %v782_v10 = vld [vmem:[%s228_s5] sm:$0xff]  ;;  %v784_v11 = vld [vmem:[%s228_s5 + $0x8] sm:$0xff]  ;;  %v786_v12 = vld [vmem:[%s228_s5 + $0x10] sm:$0xff]  ;;  %v670_v16 = vmov 0   ;;  %s857_s14 = smov (!%p262_p13, %s656_s14), 1  ;;  %s859_s13 = smov (!%p264_p0, %s652_s13), 1 }
  0x2e   : > { %v278_v13 = vadd.f32 %v784_v11, %v782_v10  ;;  %v790_v14 = vld [vmem:[%s228_s5 + $0x18] sm:$0xff]  ;;  %585 = vset.pattern.permute.xlu1 %v670_v16  ;;  %584 = vset.pattern.permute.xlu0 %v670_v16  ;;  %v501_v31 = vld [vmem:[%s235_s7 + $0x20] sm:$0xff]  ;;  %v500_v33 = vld [vmem:[%s235_s7 + $0x10] sm:$0xff]  ;;  %s497_s9 = sshll.u32 %s859_s13, 2  ;;  %s498_s8 = sshll.u32 %s857_s14, 3 }
  0x2f   : > { %v330_v15 = vadd.f32 %v790_v14, %v786_v12  ;;  %v273_v41 = vld [vmem:[%s235_s7] sm:$0xff]  ;;  %v506_v44 = vld [vmem:[%s235_s7 + $0x28] sm:$0xff]  ;;  %v505_v49 = vld [vmem:[%s235_s7 + $0x18] sm:$0xff]  ;;  %s268_s20 = sadd.s32 %s498_s8, %s497_s9 }
  0x30   : > { %279 = vadd.xlane.f32.xlu0 %v278_v13  ;;  %v504_v45 = vld [vmem:[%s235_s7 + $0x8] sm:$0xff]  ;;  %s499_s22 = sshll.u32 %s268_s20, 3 }
  0x31   : > { %s270_s26 = scalar_lea.vmem %s839_s2, %s499_s22 }
  0x34   : > { %331 = vadd.xlane.f32.xlu0 %v330_v15 }
  0xb9   : > { %v280_v17 = vpop.xlane.xlu0 %279 }
  0xba   : > { %v281_v18 = vmul.f32 0.00390625, %v280_v17 }
  0xbc   : > { %v282_v19 = vsub.f32 %v782_v10, %v281_v18  ;;  %v283_v20 = vsub.f32 %v784_v11, %v281_v18  ;;  %v300_v32 = vmul.f32 %v501_v31, %v281_v18 }
  0xbd   : > { %v332_v21 = vpop.xlane.xlu0 %331 }
  0xbe   : > { %v333_v22 = vmul.f32 0.00390625, %v332_v21  ;;  %v284_v23 = vmul.f32 %v282_v19, %v282_v19  ;;  %v285_v24 = vmul.f32 %v283_v20, %v283_v20  ;;  %v301_v34 = vadd.f32 %v500_v33, %v300_v32 }
  0xc0   : > { %v334_v25 = vsub.f32 %v786_v12, %v333_v22  ;;  %v335_v26 = vsub.f32 %v790_v14, %v333_v22  ;;  %v286_v27 = vadd.f32 %v285_v24, %v284_v23  ;;  %v352_v47 = vmul.f32 %v506_v44, %v333_v22 }
  0xc2   : > { %287 = vadd.xlane.f32.xlu1 %v286_v27  ;;  %v336_v28 = vmul.f32 %v334_v25, %v334_v25  ;;  %v337_v29 = vmul.f32 %v335_v26, %v335_v26  ;;  %v353_v50 = vadd.f32 %v505_v49, %v352_v47 }
  0xc4   : > { %v338_v30 = vadd.f32 %v337_v29, %v336_v28 }
  0xc6   : > { %339 = vadd.xlane.f32.xlu1 %v338_v30 }
  0xd7   : > { %304 = vperm.xlu1 %585, %v301_v34  }
 0x14b   : > { %v288_v35 = vpop.xlane.xlu1 %287 }
 0x14c   : > { %v289_v36 = vmul.f32 0.00390625, %v288_v35 }
 0x14e   : > { %v290_v37 = vadd.f32 1e-05, %v289_v36 }
 0x14f   : > { %v340_v38 = vpop.xlane.xlu1 %339 }
 0x150   : > { %586 = vrsqrt.f32 %v290_v37  ;;  %v341_v39 = vmul.f32 0.00390625, %v340_v38 }
 0x152   : > { %v342_v40 = vadd.f32 1e-05, %v341_v39 }
 0x153   : > { %v305_v51 = vpop.permute.xlu1 %304 }
 0x154   : > { %588 = vrsqrt.f32 %v342_v40 }
 0x15d   : > { %v587_v42 = vpop.eup %586 }
 0x15e   : > { %v292_v43 = vmul.f32 %v587_v42, %v273_v41 }
 0x160   : > { %295 = vperm.xlu0 %584, %v292_v43  }
 0x161   : > { %v589_v46 = vpop.eup %588 }
 0x162   : > { %v344_v48 = vmul.f32 %v589_v46, %v504_v45 }
 0x164   : > { %347 = vperm.xlu1 %585, %v344_v48  }
 0x168   : > { %356 = vperm.xlu1 %585, %v353_v50  }
 0x1db   : > { %v296_v52 = vpop.permute.xlu0 %295 }
 0x1dc   : > { %v298_v53 = vmul.f32 %v296_v52, %v282_v19  ;;  %v299_v54 = vmul.f32 %v296_v52, %v283_v20 }
 0x1de   : > { %v307_v55 = vadd.f32 %v305_v51, %v298_v53  ;;  %v308_v56 = vadd.f32 %v305_v51, %v299_v54 }
 0x1df   : > { %v348_v57 = vpop.permute.xlu1 %347 }
 0x1e0   : > { %v309_v58 = vmul.f32 0.5, %v307_v55  ;;  %v310_v59 = vmul.f32 0.5, %v308_v56  ;;  %v350_v60 = vmul.f32 %v348_v57, %v334_v25  ;;  %v351_v61 = vmul.f32 %v348_v57, %v335_v26 }
 0x1e2   : > { %590 = vtanh.f32 %v309_v58 }
 0x1e3   : > { %592 = vtanh.f32 %v310_v59  ;;  %v357_v62 = vpop.permute.xlu1 %356 }
 0x1e4   : > { %v359_v63 = vadd.f32 %v357_v62, %v350_v60  ;;  %v360_v0 = vadd.f32 %v357_v62, %v351_v61 }
 0x1e6   : > { %v361_v1 = vmul.f32 0.5, %v359_v63  ;;  %v362_v2 = vmul.f32 0.5, %v360_v0 }
 0x1e8   : > { %594 = vtanh.f32 %v361_v1 }
 0x1e9   : > { %596 = vtanh.f32 %v362_v2 }
 0x1ef   : > { %v591_v3 = vpop.eup %590 }
 0x1f0   : > { %v593_v4 = vpop.eup %592  ;;  %v313_v5 = vmul.f32 0.5, %v591_v3 }
 0x1f1   : > { %v314_v6 = vmul.f32 0.5, %v593_v4 }
 0x1f2   : > { %v315_v7 = vadd.f32 0.5, %v313_v5 }
 0x1f3   : > { %v316_v8 = vadd.f32 0.5, %v314_v6 }
 0x1f4   : > { %v317_v9 = vmul.f32 %v315_v7, %v782_v10 }
 0x1f5   : > { %v595_v13 = vpop.eup %594  ;;  %v318_v15 = vmul.f32 %v316_v8, %v784_v11 }
 0x1f6   : > { %v597_v16 = vpop.eup %596  ;;  %319 = vst [vmem:[%s270_s26] sm:$0xff] %v317_v9  ;;  %v365_v17 = vmul.f32 0.5, %v595_v13 }
 0x1f7   : > { %320 = vst [vmem:[%s270_s26 + $0x8] sm:$0xff] %v318_v15  ;;  %v366_v18 = vmul.f32 0.5, %v597_v16 }
 0x1f8   : > { %v367_v19 = vadd.f32 0.5, %v365_v17 }
 0x1f9   : > { %v368_v20 = vadd.f32 0.5, %v366_v18 }
 0x1fa   : > { %v369_v21 = vmul.f32 %v786_v12, %v367_v19 }
 0x1fb   : > { %v370_v22 = vmul.f32 %v790_v14, %v368_v20 }
 0x1fc   : > { %371 = vst [vmem:[%s270_s26 + $0x10] sm:$0xff] %v369_v21 }
 0x1fd   : > { %372 = vst [vmem:[%s270_s26 + $0x18] sm:$0xff] %v370_v22 }
 0x1fe PF: > { %s12_s17 = sadd.s32 1, %s668_s17   ;;  %s842_s9 = smov %s640_s10 }
 0x1ff   : > { %p9_p1 = scmp.ge.s32.totalorder %s12_s17, 6   ;;  %s843_s10 = smov %s751_s23 }
 0x200   : > { %s844_s11 = smov %s648_s12  ;;  %s845_s12 = smov %s761_s28 }
 0x201   : > { %s846_s13 = smov %s660_s15  ;;  %s847_s14 = smov %s664_s16 }
 0x202   : > { %s848_s15 = smov %s851_s18  ;;  %s849_s16 = smov %s855_s19 }
 0x203   :  { %11 = sbr.rel (!%p9_p1) target bundleno = 5 (0x5), region = 138 }

</bundles_post_ra>
